<compile_context>
chip_gen: v7x
topology: tpu7x:2x2x1
jax: 0.10.0
libtpu: 0.0.40
codegen_flags: <defaults>
</compile_context>

<pallas_src>
import jax
import jax.numpy as jnp
from jax.experimental import pallas as pl
from jax.experimental.pallas import tpu as pltpu

_SUBLANE = 8
_LANE = 128


def _vmem_limit_bytes():
    """Scoped VMEM limit, derived from the chip with a conservative fallback."""
    try:
        cap = int(pltpu.get_tpu_info().vmem_capacity_bytes)
    except Exception:
        cap = 64 * 1024 * 1024  # conservative: assume v7x-sized VMEM
    if cap <= 64 * 1024 * 1024:
        return 48 * 1024 * 1024  # v7x: leave headroom under 64 MiB physical
    return 64 * 1024 * 1024      # v5e / v6e: 128 MiB physical


def _pick_tile(rows, cols, itemsize, target_bytes):
    """Pick (tr, tc): tr multiple of 8 (or full rows), tc multiple of 128 (or
    full cols), with tr*tc*itemsize ~<= target_bytes."""
    row_bytes = cols * itemsize
    eff_rows = min(rows, _SUBLANE)
    if row_bytes * eff_rows <= target_bytes:
        # Full-width rows; tile along the row axis only.
        tc = cols
        if rows <= _SUBLANE:
            tr = rows
        else:
            tr = (target_bytes // row_bytes) // _SUBLANE * _SUBLANE
            tr = min(rows, max(_SUBLANE, tr))
    else:
        # Large planes: column-tile so the footprint stays byte-capped.
        tr = eff_rows  # full extent if rows < 8, else 8 (sublane multiple)
        tc = (target_bytes // (tr * itemsize)) // _LANE * _LANE
        tc = min(cols, max(_LANE, tc))
    return tr, tc


def _normalize_kernel(x_ref, scale_ref, bias_ref, o_ref):
    # x_ref/o_ref: (TR, TC) tile; scale_ref/bias_ref: resident (padded_rows, 1).
    tr = x_ref.shape[0]
    r0 = pl.multiple_of(pl.program_id(0) * tr, tr)
    scale = scale_ref[pl.ds(r0, tr), :]          # (TR, 1) f32
    bias = bias_ref[pl.ds(r0, tr), :]            # (TR, 1) f32
    x = x_ref[...].astype(jnp.float32)
    o_ref[...] = (x * scale + bias).astype(o_ref.dtype)


def normalize_by_channel_mean_std(x, mean, std):
    """x: (N, C, H, W); mean, std: (C,).
    Returns (x - mean[None, :, None, None]) / std[None, :, None, None]."""
    N, C, H, W = x.shape
    rows = N * C
    cols = H * W
    itemsize = jnp.dtype(x.dtype).itemsize

    vmem_limit = _vmem_limit_bytes()
    target_tile_bytes = min(4 * 1024 * 1024, vmem_limit // 8)

    tr, tc = _pick_tile(rows, cols, itemsize, target_tile_bytes)
    n_row_tiles = pl.cdiv(rows, tr)
    n_col_tiles = pl.cdiv(cols, tc)
    padded_rows = n_row_tiles * tr

    # Per-channel affine constants, f32: out = x * scale + bias.
    scale_c = 1.0 / std.astype(jnp.float32)          # (C,)
    bias_c = -mean.astype(jnp.float32) * scale_c     # (C,)

    # Per-row (= per (n, c) plane) constants, padded to whole row tiles so the
    # in-kernel pl.ds slice never reads out of bounds on the last tile.
    scale_rows = jnp.tile(scale_c, N)
    bias_rows = jnp.tile(bias_c, N)
    pad = padded_rows - rows
    if pad:
        scale_rows = jnp.pad(scale_rows, (0, pad))
        bias_rows = jnp.pad(bias_rows, (0, pad))
    scale_rows = scale_rows.reshape(padded_rows, 1)
    bias_rows = bias_rows.reshape(padded_rows, 1)

    # Lane-dense 2-D view: last dim = full spatial plane.
    x2 = x.reshape(rows, cols)

    cost = pl.CostEstimate(
        flops=2 * rows * cols,
        transcendentals=0,
        bytes_accessed=2 * rows * cols * itemsize + 2 * padded_rows * 4,
    )

    out2 = pl.pallas_call(
        _normalize_kernel,
        out_shape=jax.ShapeDtypeStruct((rows, cols), x.dtype),
        grid=(n_row_tiles, n_col_tiles),
        in_specs=[
            pl.BlockSpec((tr, tc), lambda i, j: (i, j)),           # x tile
            pl.BlockSpec((padded_rows, 1), lambda i, j: (0, 0)),   # scale (resident)
            pl.BlockSpec((padded_rows, 1), lambda i, j: (0, 0)),   # bias (resident)
        ],
        out_specs=pl.BlockSpec((tr, tc), lambda i, j: (i, j)),
        compiler_params=pltpu.CompilerParams(
            dimension_semantics=("parallel", "parallel"),
            vmem_limit_bytes=vmem_limit,
        ),
        cost_estimate=cost,
    )(x2, scale_rows, bias_rows)

    return out2.reshape(N, C, H, W)


if __name__ == "__main__":
    key = jax.random.PRNGKey(0)
    N, C, H, W = 2, 4, 16, 16

    # Deterministic "buffers" (what __init__ would register), CIFAR-like stats.
    mean = jnp.array([0.4914, 0.4822, 0.4465, 0.5000], dtype=jnp.float32)
    std = jnp.array([0.2470, 0.2435, 0.2616, 0.2500], dtype=jnp.float32)

    x = jax.random.uniform(key, (N, C, H, W), dtype=jnp.float32)

    out = normalize_by_channel_mean_std(x, mean, std)
    out = jax.block_until_ready(out)

    # Reference check against plain-JAX broadcasting semantics.
    ref = (x - mean[None, :, None, None]) / std[None, :, None, None]
    assert jnp.allclose(out, ref, atol=1e-5, rtol=1e-5), "mismatch vs reference"

    print("KERNEL_OK")
</pallas_src>

<mosaic_0001>
module attributes {stable_mosaic.version = 11 : i64} {
  func.func @_normalize_kernel(%arg0: i32, %arg1: i32, %arg2: memref<8x256xf32, #tpu.memory_space<vmem>>, %arg3: memref<8x1xf32, #tpu.memory_space<vmem>>, %arg4: memref<8x1xf32, #tpu.memory_space<vmem>>, %arg5: memref<8x256xf32, #tpu.memory_space<vmem>>) attributes {dimension_semantics = [#tpu.dimension_semantics<parallel>, #tpu.dimension_semantics<parallel>], iteration_bounds = array<i64: 1, 1>, scalar_prefetch = 0 : i64, scratch_operands = 0 : i64, tpu.core_type = #tpu.core_type<tc>, window_params = [{transform_indices = @transform_0, window_bounds = array<i64: 8, 256>}, {pipeline_mode = #tpu.pipeline_mode<synchronous>, transform_indices = @transform_1, window_bounds = array<i64: 8, 1>}, {pipeline_mode = #tpu.pipeline_mode<synchronous>, transform_indices = @transform_2, window_bounds = array<i64: 8, 1>}, {transform_indices = @transform_3, window_bounds = array<i64: 8, 256>}]} {
    %c8_i32 = arith.constant 8 : i32
    %0 = arith.muli %arg0, %c8_i32 : i32
    %1 = tpu.assume_multiple %0, 8 : i32
    %2 = arith.index_cast %1 : i32 to index
    %c0 = arith.constant 0 : index
    %3 = vector.load %arg3[%2, %c0] : memref<8x1xf32, #tpu.memory_space<vmem>>, vector<8x1xf32>
    %4 = arith.index_cast %1 : i32 to index
    %c0_0 = arith.constant 0 : index
    %5 = vector.load %arg4[%4, %c0_0] : memref<8x1xf32, #tpu.memory_space<vmem>>, vector<8x1xf32>
    %c0_1 = arith.constant 0 : index
    %c0_2 = arith.constant 0 : index
    %6 = vector.load %arg2[%c0_1, %c0_2] : memref<8x256xf32, #tpu.memory_space<vmem>>, vector<8x256xf32>
    %7 = vector.broadcast %3 : vector<8x1xf32> to vector<8x256xf32>
    %8 = arith.mulf %6, %7 : vector<8x256xf32>
    %9 = vector.broadcast %5 : vector<8x1xf32> to vector<8x256xf32>
    %10 = arith.addf %8, %9 : vector<8x256xf32>
    %c0_3 = arith.constant 0 : index
    %c0_4 = arith.constant 0 : index
    %11 = vector.load %arg5[%c0_3, %c0_4] : memref<8x256xf32, #tpu.memory_space<vmem>>, vector<8x256xf32>
    tpu.vector_store %arg5[%c0_3, %c0_4], %10 {strides = array<i32>} : memref<8x256xf32, #tpu.memory_space<vmem>>, vector<8x256xf32>,
    return
  }
  func.func @transform_0(%arg0: i32, %arg1: i32) -> (i32, i32) {
    %c0_i32 = arith.constant 0 : i32
    return %arg0, %arg1 : i32, i32
  }
  func.func @transform_1(%arg0: i32, %arg1: i32) -> (i32, i32) {
    %c0_i32 = arith.constant 0 : i32
    %c0_i32_0 = arith.constant 0 : i32
    %c0_i32_1 = arith.constant 0 : i32
    return %c0_i32, %c0_i32_0 : i32, i32
  }
  func.func @transform_2(%arg0: i32, %arg1: i32) -> (i32, i32) {
    %c0_i32 = arith.constant 0 : i32
    %c0_i32_0 = arith.constant 0 : i32
    %c0_i32_1 = arith.constant 0 : i32
    return %c0_i32, %c0_i32_0 : i32, i32
  }
  func.func @transform_3(%arg0: i32, %arg1: i32) -> (i32, i32) {
    %c0_i32 = arith.constant 0 : i32
    return %arg0, %arg1 : i32, i32
  }
}

</mosaic_0001>

<bundles_post_ra>
// kernel: tpu_custom_call.1
= control target key start
LH: loop header
LB: loop body
LE: loop exit
PB: predicated region body
PF: predicated region fallthrough
CT: control target
= control target key end

     0   :  { %v79_v1 = vmov 0   ;;  %s125_s0 = inlined_call_operand.vmem [shape: f32[8,256], index: 0, kind: input, shape index: {}]   ;;  %s126_s1 = inlined_call_operand.vmem [shape: f32[8,1], index: 1, kind: input, shape index: {}]   ;;  %s127_s2 = inlined_call_operand.vmem [shape: f32[8,1], index: 2, kind: input, shape index: {}]   ;;  %s128_s3 = inlined_call_operand.hbm [shape: f32[8,256], index: 3, kind: output, shape index: {}]  }
   0x1   :  { %v17_v0 = vld [vmem:[%s126_s1] sm:$0xff]  ;;  %54 = vset.pattern.permute.xlu0 %v79_v1 }
   0x2   :  { %8 = vsyncpa [#allocation3], 0  ;;  %24 = vperm.xlu0 %54, %v17_v0   ;;  %v19_v2 = vld [vmem:[%s127_s2] sm:$0xff]  ;;  %v21_v4 = vld [vmem:[%s125_s0 + $0x8] sm:$0xff]  ;;  %s80_s20 = smov [#allocation2]  }
   0x3   :  { %v20_v3 = vld [vmem:[%s125_s0] sm:$0xff]  ;;  %s44_s1 = sshll.u32 %s80_s20, 4  ;;  %s45_s1 = int_to_ptr.vmem [resolvable:$true] %s44_s1 }
   0x4   :  { %s55_s2 = scalar_lea.vmem %s45_s1, 256  ;;  %p60_p1 = scmp.lt.s32.totalorder %s45_s1, %s45_s1 }
   0x5   :  { %p56_p0 = scmp.ne.s32.totalorder %s45_s1, %s55_s2  ;;  %p61_p2 = scmp.lt.s32.totalorder %s55_s2, %s55_s2 }
   0x6   :  { %31 = vperm.xlu0 %54, %v19_v2  }
   0x7   :  { %p62_p3 = por %p61_p2, %p60_p1 }
   0x9   :  { %p63_p4 = pnand %p62_p3, %p56_p0 }
  0x81   :  { %v25_v5 = vpop.permute.xlu0 %24 }
  0x82   :  { %v27_v6 = vmul.f32 %v25_v5, %v20_v3  ;;  %v28_v7 = vmul.f32 %v25_v5, %v21_v4 }
  0x85   :  { %v32_v8 = vpop.permute.xlu0 %31 }
  0x86   :  { %v34_v9 = vadd.f32 %v32_v8, %v27_v6  ;;  %v35_v10 = vadd.f32 %v32_v8, %v28_v7 }
  0x88   :  { %36 = vst [vmem:[#allocation2] sm:$0xff] %v34_v9  ;;  %37 = vst [vmem:[#allocation2 + $0x8] sm:$0xff] %v35_v10 }
  0x89   :  { %66 = shalt.err (!%p63_p4)
}
  0x8a   :  { %s67_s22 = scalar_lea.hbm %s128_s3, 256 }
  0x8b   :  { %p68_p5 = scmp.ne.s32.totalorder %s128_s3, %s67_s22  ;;  %p71_p6 = scmp.lt.u32.totalorder %s67_s22, %s128_s3 }
  0x8d   :  { %p73_p7 = pnand %p71_p6, %p68_p5 }
  0x8f   :  { %76 = shalt.err (!%p73_p7)
}
  0x90   :  { %47 = dma.vmem_to_hbm [thread:$0]  %s45_s1, 256, %s128_s3, [#allocation3]  }
  0x91   :  { %77 = dma.done.wait [#allocation3], 256  }
  0x92   :  { %78 = vsyncadd [#allocation3], 4294967040 }
  0x93   :  { %51 = vsyncpa [#allocation3], 1 }

</bundles_post_ra>
